<compile_context>
chip_gen: v7x
topology: tpu7x:2x2x1
jax: 0.10.0
libtpu: 0.0.40
codegen_flags: <defaults>
</compile_context>

<pallas_src>
import jax
import jax.numpy as jnp
from jax.experimental import pallas as pl
from jax.experimental.pallas import tpu as pltpu


def _round_up(n, m):
    return ((n + m - 1) // m) * m


def _mlp_kernel(x_ref, w1_ref, b1_ref, w2_ref, b2_ref, w3_ref, b3_ref, o_ref):
    # One batch tile per grid step; weights/biases are VMEM-resident.
    wdt = w1_ref.dtype                       # bf16 (fast path) or f32 (exact path)
    x = x_ref[...].astype(wdt)               # cast in-kernel (no extra HBM pass)
    h1 = jnp.tanh(                           # accumulate + tanh in f32
        jnp.dot(x, w1_ref[...], preferred_element_type=jnp.float32) + b1_ref[...]
    )
    h2 = jnp.tanh(
        jnp.dot(h1.astype(wdt), w2_ref[...], preferred_element_type=jnp.float32)
        + b2_ref[...]
    )
    out = (
        jnp.dot(h2.astype(wdt), w3_ref[...], preferred_element_type=jnp.float32)
        + b3_ref[...]
    )
    o_ref[...] = out.astype(o_ref.dtype)


def prepare_params(params, *, use_bf16=True, lane=128):
    """One-time parameter prep (call once, reuse across millions of forwards).

    - zero-pads hidden 84 -> 128 and action_dim -> 128 (lane-dense output);
      numerically exact (tanh(0)=0 columns feed zero rows of w2/w3, padded
      output lanes are exactly 0 and sliced off in the wrapper).
    - optionally casts weights to bf16 (MXU operands); biases stay f32 since
      accumulation / tanh are f32.
    """
    w1, b1 = params["w1"], params["b1"]
    w2, b2 = params["w2"], params["b2"]
    w3, b3 = params["w3"], params["b3"]

    hidden = w1.shape[1]
    action_dim = w3.shape[1]

    H = _round_up(max(hidden, lane), lane)
    N = _round_up(max(action_dim, lane), lane)

    ph, pn = H - hidden, N - action_dim
    if ph:
        w1 = jnp.pad(w1, ((0, 0), (0, ph)))
        b1 = jnp.pad(b1, ((0, 0), (0, ph)))
        w2 = jnp.pad(w2, ((0, ph), (0, ph)))
        b2 = jnp.pad(b2, ((0, 0), (0, ph)))
        w3 = jnp.pad(w3, ((0, ph), (0, 0)))
    if pn:
        w3 = jnp.pad(w3, ((0, 0), (0, pn)))
        b3 = jnp.pad(b3, ((0, 0), (0, pn)))

    wdt = jnp.bfloat16 if use_bf16 else jnp.float32
    return dict(
        w1=w1.astype(wdt), b1=b1.astype(jnp.float32),
        w2=w2.astype(wdt), b2=b2.astype(jnp.float32),
        w3=w3.astype(wdt), b3=b3.astype(jnp.float32),
        action_dim=action_dim,
    )


def _choose_tile_b(B, tile_b):
    # Small batches: a single block (block dim == full array dim is always legal,
    # no sublane-multiple requirement, no padding needed).
    if B < 256:
        return B
    # Large batches: at least 2 grid steps so the "parallel" axis shards across
    # v7x's two TensorCores; capped at tile_b rows; multiple of 8 (sublanes).
    half = _round_up(pl.cdiv(B, 2), 8)
    return _round_up(min(max(tile_b, 8), half), 8)


def net_forward(x, prep, *, tile_b=4096):
    """Forward pass of Net as a batch-tiled Pallas kernel.

    x:    (B, input_dim) float32
    prep: output of prepare_params().
    """
    w1, b1 = prep["w1"], prep["b1"]
    w2, b2 = prep["w2"], prep["b2"]
    w3, b3 = prep["w3"], prep["b3"]
    action_dim = prep["action_dim"]

    B, in_dim = x.shape
    H = w1.shape[1]
    N = w3.shape[1]

    tb = _choose_tile_b(B, tile_b)
    grid = (pl.cdiv(B, tb),)   # ragged last block handled by masked writes

    # Weights/biases stay VMEM-resident across grid steps (same block index).
    resident = lambda shape: pl.BlockSpec(shape, lambda i: (0, 0))

    wbytes = sum(
        int(a.size) * a.dtype.itemsize for a in (w1, b1, w2, b2, w3, b3)
    )
    flops = 2 * B * (in_dim * H + H * H + H * N)
    transcendentals = 2 * B * H
    bytes_accessed = 4 * B * (in_dim + N) + wbytes

    out = pl.pallas_call(
        _mlp_kernel,
        out_shape=jax.ShapeDtypeStruct((B, N), jnp.float32),
        grid_spec=pltpu.PrefetchScalarGridSpec(
            num_scalar_prefetch=0,
            grid=grid,
            in_specs=[
                pl.BlockSpec((tb, in_dim), lambda i: (i, 0)),   # x: streamed
                resident((in_dim, H)),                          # w1
                resident((1, H)),                               # b1
                resident((H, H)),                               # w2
                resident((1, H)),                               # b2
                resident((H, N)),                               # w3 (lane-dense out)
                resident((1, N)),                               # b3
            ],
            out_specs=pl.BlockSpec((tb, N), lambda i: (i, 0)),
        ),
        compiler_params=pltpu.CompilerParams(
            dimension_semantics=("parallel",),      # megacore sharding on v7x
            vmem_limit_bytes=32 * 1024 * 1024,      # headroom for large tiles (safe on v5e/v6e/v7x)
        ),
        cost_estimate=pl.CostEstimate(
            flops=flops,
            transcendentals=transcendentals,
            bytes_accessed=bytes_accessed,
        ),
    )(x, w1, b1, w2, b2, w3, b3)

    return out[:, :action_dim] if N != action_dim else out


def init_params(key, input_dim, action_dim, hidden=84):
    """Deterministic synthetic init mirroring the nn.Linear shapes of Net."""
    k1, k2, k3, k4, k5, k6 = jax.random.split(key, 6)

    def lin(kw, kb, fan_in, fan_out):
        bound = 1.0 / jnp.sqrt(fan_in)
        w = jax.random.uniform(kw, (fan_in, fan_out), jnp.float32, -bound, bound)
        b = jax.random.uniform(kb, (1, fan_out), jnp.float32, -bound, bound)
        return w, b

    w1, b1 = lin(k1, k2, input_dim, hidden)
    w2, b2 = lin(k3, k4, hidden, hidden)
    w3, b3 = lin(k5, k6, hidden, action_dim)
    return dict(w1=w1, b1=b1, w2=w2, b2=b2, w3=w3, b3=b3)


def net_forward_ref(x, p):
    h1 = jnp.tanh(x @ p["w1"] + p["b1"])
    h2 = jnp.tanh(h1 @ p["w2"] + p["b2"])
    return h2 @ p["w3"] + p["b3"]


if __name__ == "__main__":
    key = jax.random.PRNGKey(0)
    kx, kp, kx2 = jax.random.split(key, 3)

    input_dim, action_dim = 32, 8
    params = init_params(kp, input_dim, action_dim)

    # --- exact f32 path, small inference-style batch (single full block) ---
    prep_f32 = prepare_params(params, use_bf16=False)
    x = jax.random.normal(kx, (2, input_dim), jnp.float32)
    out = net_forward(x, prep_f32)
    jax.block_until_ready(out)
    ref = net_forward_ref(x, params)
    assert out.shape == (2, action_dim)
    assert jnp.allclose(out, ref, atol=1e-5, rtol=1e-5), "mismatch (f32, B=2)"

    # --- f32 path, larger batch: multi-step grid + ragged (masked) last block ---
    x2 = jax.random.normal(kx2, (1000, input_dim), jnp.float32)
    out2 = net_forward(x2, prep_f32, tile_b=256)
    jax.block_until_ready(out2)
    ref2 = net_forward_ref(x2, params)
    assert out2.shape == (1000, action_dim)
    assert jnp.allclose(out2, ref2, atol=1e-5, rtol=1e-5), "mismatch (f32, B=1000)"

    # --- default perf path: bf16 MXU operands, f32 accumulation / tanh ---
    prep_bf16 = prepare_params(params, use_bf16=True)
    out3 = net_forward(x2, prep_bf16, tile_b=256)
    jax.block_until_ready(out3)
    assert out3.shape == (1000, action_dim)
    assert jnp.allclose(out3, ref2, atol=3e-2, rtol=3e-2), "mismatch (bf16, B=1000)"

    print("KERNEL_OK")
</pallas_src>

<mosaic_0001>
module attributes {stable_mosaic.version = 11 : i64} {
  func.func @_mlp_kernel(%arg0: i32, %arg1: memref<2x32xf32, #tpu.memory_space<vmem>>, %arg2: memref<32x128xf32, #tpu.memory_space<vmem>>, %arg3: memref<1x128xf32, #tpu.memory_space<vmem>>, %arg4: memref<128x128xf32, #tpu.memory_space<vmem>>, %arg5: memref<1x128xf32, #tpu.memory_space<vmem>>, %arg6: memref<128x128xf32, #tpu.memory_space<vmem>>, %arg7: memref<1x128xf32, #tpu.memory_space<vmem>>, %arg8: memref<2x128xf32, #tpu.memory_space<vmem>>) attributes {dimension_semantics = [#tpu.dimension_semantics<parallel>], iteration_bounds = array<i64: 1>, scalar_prefetch = 0 : i64, scratch_operands = 0 : i64, tpu.core_type = #tpu.core_type<tc>, window_params = [{transform_indices = @transform_0, window_bounds = array<i64: 2, 32>}, {pipeline_mode = #tpu.pipeline_mode<synchronous>, transform_indices = @transform_1, window_bounds = array<i64: 32, 128>}, {pipeline_mode = #tpu.pipeline_mode<synchronous>, transform_indices = @transform_2, window_bounds = array<i64: 1, 128>}, {pipeline_mode = #tpu.pipeline_mode<synchronous>, transform_indices = @transform_3, window_bounds = array<i64: 128, 128>}, {pipeline_mode = #tpu.pipeline_mode<synchronous>, transform_indices = @transform_4, window_bounds = array<i64: 1, 128>}, {pipeline_mode = #tpu.pipeline_mode<synchronous>, transform_indices = @transform_5, window_bounds = array<i64: 128, 128>}, {pipeline_mode = #tpu.pipeline_mode<synchronous>, transform_indices = @transform_6, window_bounds = array<i64: 1, 128>}, {transform_indices = @transform_7, window_bounds = array<i64: 2, 128>}]} {
    %c0 = arith.constant 0 : index
    %c0_0 = arith.constant 0 : index
    %0 = vector.load %arg1[%c0, %c0_0] : memref<2x32xf32, #tpu.memory_space<vmem>>, vector<2x32xf32>
    %c0_1 = arith.constant 0 : index
    %c0_2 = arith.constant 0 : index
    %1 = vector.load %arg2[%c0_1, %c0_2] : memref<32x128xf32, #tpu.memory_space<vmem>>, vector<32x128xf32>
    %cst = arith.constant dense<0.000000e+00> : vector<2x128xf32>
    %2 = tpu.matmul %0, %1, %cst {dimension_numbers = #tpu.dot_dimension_numbers<[1], [0], [0], [1], [0, 0, 1, 1], [], []>} : vector<2x32xf32>, vector<32x128xf32>, vector<2x128xf32> -> vector<2x128xf32>
    %c0_3 = arith.constant 0 : index
    %c0_4 = arith.constant 0 : index
    %3 = vector.load %arg3[%c0_3, %c0_4] : memref<1x128xf32, #tpu.memory_space<vmem>>, vector<1x128xf32>
    %4 = vector.broadcast %3 : vector<1x128xf32> to vector<2x128xf32>
    %5 = arith.addf %2, %4 : vector<2x128xf32>
    %6 = math.tanh %5 : vector<2x128xf32>
    %c0_5 = arith.constant 0 : index
    %c0_6 = arith.constant 0 : index
    %7 = vector.load %arg4[%c0_5, %c0_6] : memref<128x128xf32, #tpu.memory_space<vmem>>, vector<128x128xf32>
    %cst_7 = arith.constant dense<0.000000e+00> : vector<2x128xf32>
    %8 = tpu.matmul %6, %7, %cst_7 {dimension_numbers = #tpu.dot_dimension_numbers<[1], [0], [0], [1], [0, 0, 1, 1], [], []>} : vector<2x128xf32>, vector<128x128xf32>, vector<2x128xf32> -> vector<2x128xf32>
    %c0_8 = arith.constant 0 : index
    %c0_9 = arith.constant 0 : index
    %9 = vector.load %arg5[%c0_8, %c0_9] : memref<1x128xf32, #tpu.memory_space<vmem>>, vector<1x128xf32>
    %10 = vector.broadcast %9 : vector<1x128xf32> to vector<2x128xf32>
    %11 = arith.addf %8, %10 : vector<2x128xf32>
    %12 = math.tanh %11 : vector<2x128xf32>
    %c0_10 = arith.constant 0 : index
    %c0_11 = arith.constant 0 : index
    %13 = vector.load %arg6[%c0_10, %c0_11] : memref<128x128xf32, #tpu.memory_space<vmem>>, vector<128x128xf32>
    %cst_12 = arith.constant dense<0.000000e+00> : vector<2x128xf32>
    %14 = tpu.matmul %12, %13, %cst_12 {dimension_numbers = #tpu.dot_dimension_numbers<[1], [0], [0], [1], [0, 0, 1, 1], [], []>} : vector<2x128xf32>, vector<128x128xf32>, vector<2x128xf32> -> vector<2x128xf32>
    %c0_13 = arith.constant 0 : index
    %c0_14 = arith.constant 0 : index
    %15 = vector.load %arg7[%c0_13, %c0_14] : memref<1x128xf32, #tpu.memory_space<vmem>>, vector<1x128xf32>
    %16 = vector.broadcast %15 : vector<1x128xf32> to vector<2x128xf32>
    %17 = arith.addf %14, %16 : vector<2x128xf32>
    %c0_15 = arith.constant 0 : index
    %c0_16 = arith.constant 0 : index
    %18 = vector.load %arg8[%c0_15, %c0_16] : memref<2x128xf32, #tpu.memory_space<vmem>>, vector<2x128xf32>
    tpu.vector_store %arg8[%c0_15, %c0_16], %17 {strides = array<i32>} : memref<2x128xf32, #tpu.memory_space<vmem>>, vector<2x128xf32>,
    return
  }
  func.func @transform_0(%arg0: i32) -> (i32, i32) {
    %c0_i32 = arith.constant 0 : i32
    %c0_i32_0 = arith.constant 0 : i32
    return %arg0, %c0_i32 : i32, i32
  }
  func.func @transform_1(%arg0: i32) -> (i32, i32) {
    %c0_i32 = arith.constant 0 : i32
    %c0_i32_0 = arith.constant 0 : i32
    %c0_i32_1 = arith.constant 0 : i32
    return %c0_i32, %c0_i32_0 : i32, i32
  }
  func.func @transform_2(%arg0: i32) -> (i32, i32) {
    %c0_i32 = arith.constant 0 : i32
    %c0_i32_0 = arith.constant 0 : i32
    %c0_i32_1 = arith.constant 0 : i32
    return %c0_i32, %c0_i32_0 : i32, i32
  }
  func.func @transform_3(%arg0: i32) -> (i32, i32) {
    %c0_i32 = arith.constant 0 : i32
    %c0_i32_0 = arith.constant 0 : i32
    %c0_i32_1 = arith.constant 0 : i32
    return %c0_i32, %c0_i32_0 : i32, i32
  }
  func.func @transform_4(%arg0: i32) -> (i32, i32) {
    %c0_i32 = arith.constant 0 : i32
    %c0_i32_0 = arith.constant 0 : i32
    %c0_i32_1 = arith.constant 0 : i32
    return %c0_i32, %c0_i32_0 : i32, i32
  }
  func.func @transform_5(%arg0: i32) -> (i32, i32) {
    %c0_i32 = arith.constant 0 : i32
    %c0_i32_0 = arith.constant 0 : i32
    %c0_i32_1 = arith.constant 0 : i32
    return %c0_i32, %c0_i32_0 : i32, i32
  }
  func.func @transform_6(%arg0: i32) -> (i32, i32) {
    %c0_i32 = arith.constant 0 : i32
    %c0_i32_0 = arith.constant 0 : i32
    %c0_i32_1 = arith.constant 0 : i32
    return %c0_i32, %c0_i32_0 : i32, i32
  }
  func.func @transform_7(%arg0: i32) -> (i32, i32) {
    %c0_i32 = arith.constant 0 : i32
    %c0_i32_0 = arith.constant 0 : i32
    return %arg0, %c0_i32 : i32, i32
  }
}

</mosaic_0001>

<bundles_post_ra>
// kernel: tpu_custom_call.1
= control target key start
LH: loop header
LB: loop body
LE: loop exit
PB: predicated region body
PF: predicated region fallthrough
CT: control target
= control target key end

     0   :  { %12 = vsyncpa [#allocation3], 0  ;;  %s831_s0 = inlined_call_operand.hbm [shape: f32[2,32], index: 0, kind: input, shape index: {}]   ;;  %s832_s1 = inlined_call_operand.hbm [shape: f32[32,128], index: 1, kind: input, shape index: {}]   ;;  %s833_s2 = inlined_call_operand.vmem [shape: f32[1,128], index: 2, kind: input, shape index: {}]   ;;  %s834_s3 = inlined_call_operand.hbm [shape: f32[128,128], index: 3, kind: input, shape index: {}]   ;;  %s835_s4 = inlined_call_operand.vmem [shape: f32[1,128], index: 4, kind: input, shape index: {}]   ;;  %s836_s5 = inlined_call_operand.hbm [shape: f32[128,128], index: 5, kind: input, shape index: {}]   ;;  %s837_s6 = inlined_call_operand.vmem [shape: f32[1,128], index: 6, kind: input, shape index: {}]   ;;  %s838_s7 = inlined_call_operand.hbm [shape: f32[2,128], index: 7, kind: output, shape index: {}]  }
   0x1   :  { %13 = vsyncpa [#allocation6], 0 }
   0x2   :  { %14 = vsyncpa [#allocation9], 0 }
   0x3   :  { %15 = vsyncpa [#allocation4], 0  ;;  %s682_s24 = smov [#allocation5]   ;;  %s564_s28 = scalar_lea.hbm %s832_s1, 512 }
   0x4   :  { %s31_s25 = sshll.u32 %s682_s24, 4  ;;  %p565_p0 = scmp.ne.s32.totalorder %s832_s1, %s564_s28  ;;  %s32_s25 = int_to_ptr.vmem [resolvable:$true] %s31_s25 }
   0x5   :  { %p568_p1 = scmp.lt.u32.totalorder %s564_s28, %s832_s1 }
   0x7   :  { %p570_p2 = pnand %p568_p1, %p565_p0 }
   0x9   :  { %573 = shalt.err (!%p570_p2)
}
   0xa   :  { %s574_s10 = scalar_lea.vmem %s32_s25, 512  ;;  %p579_p4 = scmp.lt.s32.totalorder %s32_s25, %s32_s25 }
   0xb   :  { %p575_p3 = scmp.ne.s32.totalorder %s32_s25, %s574_s10  ;;  %p580_p5 = scmp.lt.s32.totalorder %s574_s10, %s574_s10 }
   0xd   :  { %p581_p6 = por %p580_p5, %p579_p4 }
   0xf   :  { %p582_p7 = pnand %p581_p6, %p575_p3 }
  0x11   :  { %585 = shalt.err (!%p582_p7)
}
  0x12   :  { %s683_s11 = smov 128   ;;  %s684_s12 = smov 8  }
  0x13   :  { %37 = dma.hbm_to_vmem [thread:$0]  %s832_s1, 512, %s32_s25, [#allocation6], %s683_s11, %s683_s11, %s684_s12  }
  0x14   :  { %s685_s15 = smov [#allocation2]   ;;  %s686_s17 = smov [#allocation7]  }
  0x15   :  { %s22_s16 = sshll.u32 %s685_s15, 4  ;;  %s45_s18 = sshll.u32 %s686_s17, 4  ;;  %s23_s16 = int_to_ptr.vmem [resolvable:$true] %s22_s16  ;;  %s46_s18 = int_to_ptr.vmem [resolvable:$true] %s45_s18 }
  0x16   :  { %s586_s21 = scalar_lea.hbm %s831_s0, 32 }
  0x17   :  { %p587_p8 = scmp.ne.s32.totalorder %s831_s0, %s586_s21  ;;  %p590_p9 = scmp.lt.u32.totalorder %s586_s21, %s831_s0 }
  0x19   :  { %p592_p10 = pnand %p590_p9, %p587_p8 }
  0x1b   :  { %595 = shalt.err (!%p592_p10)
}
  0x1c   :  { %s596_s1 = scalar_lea.vmem %s23_s16, 32  ;;  %p601_p12 = scmp.lt.s32.totalorder %s23_s16, %s23_s16 }
  0x1d   :  { %p597_p11 = scmp.ne.s32.totalorder %s23_s16, %s596_s1  ;;  %p602_p13 = scmp.lt.s32.totalorder %s596_s1, %s596_s1 }
  0x1f   :  { %p603_p0 = por %p602_p13, %p601_p12 }
  0x21   :  { %p604_p1 = pnand %p603_p0, %p597_p11 }
  0x23   :  { %607 = shalt.err (!%p604_p1)
}
  0x24   :  { %25 = dma.hbm_to_vmem [thread:$0]  %s831_s0, 32, %s23_s16, [#allocation3]  }
  0x25   :  { %s608_s30 = scalar_lea.hbm %s834_s3, 2048 }
  0x26   :  { %p609_p2 = scmp.ne.s32.totalorder %s834_s3, %s608_s30  ;;  %p612_p3 = scmp.lt.u32.totalorder %s608_s30, %s834_s3 }
  0x28   :  { %p614_p4 = pnand %p612_p3, %p609_p2 }
  0x2a   :  { %617 = shalt.err (!%p614_p4)
}
  0x2b   :  { %s618_s14 = scalar_lea.vmem %s46_s18, 2048  ;;  %p623_p6 = scmp.lt.s32.totalorder %s46_s18, %s46_s18 }
  0x2c   :  { %p619_p5 = scmp.ne.s32.totalorder %s46_s18, %s618_s14  ;;  %p624_p7 = scmp.lt.s32.totalorder %s618_s14, %s618_s14 }
  0x2e   :  { %p625_p8 = por %p624_p7, %p623_p6 }
  0x30   :  { %p626_p9 = pnand %p625_p8, %p619_p5 }
  0x32   :  { %629 = shalt.err (!%p626_p9)
}
  0x33   :  { %51 = dma.hbm_to_vmem [thread:$0]  %s834_s3, 2048, %s46_s18, [#allocation6], %s683_s11, %s683_s11, %s684_s12  }
  0x34   :  { %s687_s16 = smov [#allocation8]   ;;  %s630_s21 = scalar_lea.hbm %s836_s5, 2048 }
  0x35   :  { %s59_s17 = sshll.u32 %s687_s16, 4  ;;  %p631_p10 = scmp.ne.s32.totalorder %s836_s5, %s630_s21  ;;  %s60_s17 = int_to_ptr.vmem [resolvable:$true] %s59_s17 }
  0x36   :  { %p634_p11 = scmp.lt.u32.totalorder %s630_s21, %s836_s5 }
  0x38   :  { %p636_p12 = pnand %p634_p11, %p631_p10 }
  0x3a   :  { %639 = shalt.err (!%p636_p12)
}
  0x3b   :  { %s640_s1 = scalar_lea.vmem %s60_s17, 2048  ;;  %p645_p0 = scmp.lt.s32.totalorder %s60_s17, %s60_s17 }
  0x3c   :  { %p641_p13 = scmp.ne.s32.totalorder %s60_s17, %s640_s1  ;;  %p646_p1 = scmp.lt.s32.totalorder %s640_s1, %s640_s1 }
  0x3e   :  { %p647_p2 = por %p646_p1, %p645_p0 }
  0x40   :  { %p648_p3 = pnand %p647_p2, %p641_p13 }
  0x42   :  { %651 = shalt.err (!%p648_p3)
}
  0x43   :  { %65 = dma.hbm_to_vmem [thread:$0]  %s836_s5, 2048, %s60_s17, [#allocation9], %s683_s11, %s683_s11, %s684_s12  }
  0x44   :  { %674 = dma.done.wait [#allocation3], 32  }
  0x45   :  { %675 = vsyncadd [#allocation3], 4294967264 }
  0x46   :  { %676 = dma.done.wait [#allocation6], 2560  }
  0x47   :  { %677 = vsyncadd [#allocation6], 4294964736 }
  0x48   :  { %678 = dma.done.wait [#allocation9], 2048  }
  0x49   :  { %679 = vsyncadd [#allocation9], 4294965248  ;;  %v688_v0 = vmov 0.0|0.0   ;;  %vm689_vm0 = vmmov 0   ;;  %v690_v1 = vmov 0.0   ;;  %v81_v2 = vld [vmem:[#allocation5] sm:$0xff] }
  0x4a   :  { %496 = vmatprep.subr.bf16.mxu0 %v688_v0  ;;  %423 = vmatprep.mubr.msk.f32.mxu0 %vm689_vm0, %v690_v1  ;;  %v82_v3 = vld [vmem:[#allocation5 + $0x8] sm:$0xff]  ;;  %v83_v4 = vld [vmem:[#allocation5 + $0x10] sm:$0xff]  ;;  %v84_v6 = vld [vmem:[#allocation5 + $0x18] sm:$0xff]  ;;  %vm92_vm1 = vcmask 261120   ;;  %s691_s28 = smov [#allocation10]  }
  0x4b   :  { %502 = vmatprep.subr.bf16.mxu1 %v688_v0  ;;  %458 = vmatprep.mubr.msk.f32.mxu1 %vm689_vm0, %v690_v1  ;;  %v497_v5 = vpack.c.bf16 %v82_v3, %v81_v2  ;;  %v167_v7 = vld [vmem:[#allocation7] sm:$0xff]  ;;  %v168_v8 = vld [vmem:[#allocation7 + $0x8] sm:$0xff]  ;;  %v169_v9 = vld [vmem:[#allocation7 + $0x10] sm:$0xff]  ;;  %v500_v11 = vpack.c.bf16 %v84_v6, %v83_v4  ;;  %s361_s29 = sshll.u32 %s691_s28, 4  ;;  %s362_s29 = int_to_ptr.vmem [resolvable:$true] %s361_s29 }
  0x4c   :  { %v170_v10 = vld [vmem:[#allocation7 + $0x18] sm:$0xff]  ;;  %v503_v12 = vpack.c.bf16 %v168_v8, %v167_v7  ;;  %v171_v14 = vld [vmem:[#allocation7 + $0x20] sm:$0xff]  ;;  %v172_v15 = vld [vmem:[#allocation7 + $0x28] sm:$0xff]  ;;  %s652_s30 = scalar_lea.vmem %s362_s29, 32  ;;  %p657_p5 = scmp.lt.s32.totalorder %s362_s29, %s362_s29 }
  0x4d   :  { %498 = vmatpush3.bf16.msra.mxu0 %v497_v5  ;;  %v506_v13 = vpack.c.bf16 %v170_v10, %v169_v9  ;;  %v80_v16 = vld [vmem:[#allocation2] sm:$0x3]  ;;  %v509_v17 = vpack.c.bf16 %v172_v15, %v171_v14  ;;  %v173_v18 = vld [vmem:[#allocation7 + $0x30] sm:$0xff]  ;;  %v175_v21 = vld [vmem:[#allocation7 + $0x40] sm:$0xff]  ;;  %p653_p4 = scmp.ne.s32.totalorder %s362_s29, %s652_s30  ;;  %p658_p6 = scmp.lt.s32.totalorder %s652_s30, %s652_s30 }
  0x4e   :  { %499 = vmatprep.subr.bf16.mxu0 %v688_v0  ;;  %504 = vmatpush3.bf16.msra.mxu1 %v503_v12  ;;  %v174_v19 = vld [vmem:[#allocation7 + $0x38] sm:$0xff]  ;;  %v176_v22 = vld [vmem:[#allocation7 + $0x48] sm:$0xff]  ;;  %v177_v24 = vld [vmem:[#allocation7 + $0x50] sm:$0xff] }
  0x4f   :  { %505 = vmatprep.subr.bf16.mxu1 %v688_v0  ;;  %v512_v20 = vpack.c.bf16 %v174_v19, %v173_v18  ;;  %v515_v23 = vpack.c.bf16 %v176_v22, %v175_v21  ;;  %v178_v25 = vld [vmem:[#allocation7 + $0x58] sm:$0xff]  ;;  %v179_v27 = vld [vmem:[#allocation7 + $0x60] sm:$0xff]  ;;  %v180_v28 = vld [vmem:[#allocation7 + $0x68] sm:$0xff]  ;;  %p659_p7 = por %p658_p6, %p657_p5 }
  0x50   :  { %v518_v26 = vpack.c.bf16 %v178_v25, %v177_v24  ;;  %v521_v29 = vpack.c.bf16 %v180_v28, %v179_v27  ;;  %v181_v30 = vld [vmem:[#allocation7 + $0x70] sm:$0xff]  ;;  %v182_v31 = vld [vmem:[#allocation7 + $0x78] sm:$0xff]  ;;  %v261_v33 = vld [vmem:[#allocation8] sm:$0xff] }
  0x51   :  { %501 = vmatpush3.bf16.msra.mxu0 %v500_v11  ;;  %v524_v32 = vpack.c.bf16 %v182_v31, %v181_v30  ;;  %v262_v34 = vld [vmem:[#allocation8 + $0x8] sm:$0xff]  ;;  %v263_v35 = vld [vmem:[#allocation8 + $0x10] sm:$0xff]  ;;  %v264_v37 = vld [vmem:[#allocation8 + $0x18] sm:$0xff]  ;;  %p660_p8 = pnand %p659_p7, %p653_p4 }
  0x52   :  { %526 = vmatprep.subr.bf16.mxu0 %v688_v0  ;;  %507 = vmatpush3.bf16.msra.mxu1 %v506_v13  ;;  %v527_v36 = vpack.c.bf16 %v262_v34, %v261_v33  ;;  %v530_v38 = vpack.c.bf16 %v264_v37, %v263_v35  ;;  %v265_v39 = vld [vmem:[#allocation8 + $0x20] sm:$0xff]  ;;  %v266_v40 = vld [vmem:[#allocation8 + $0x28] sm:$0xff]  ;;  %v267_v42 = vld [vmem:[#allocation8 + $0x30] sm:$0xff] }
  0x53   :  { %508 = vmatprep.subr.bf16.mxu1 %v688_v0  ;;  %v533_v41 = vpack.c.bf16 %v266_v40, %v265_v39  ;;  %v268_v43 = vld [vmem:[#allocation8 + $0x38] sm:$0xff]  ;;  %v269_v45 = vld [vmem:[#allocation8 + $0x40] sm:$0xff]  ;;  %v270_v46 = vld [vmem:[#allocation8 + $0x48] sm:$0xff] }
  0x54   :  { %424 = vmatmul.mubr.msk.f32.vlgmr.msra.gmra.mrb[0].mxu0 %vm92_vm1, %v80_v16  ;;  %v536_v44 = vpack.c.bf16 %v268_v43, %v267_v42  ;;  %v539_v47 = vpack.c.bf16 %v270_v46, %v269_v45  ;;  %v372_v48 = vld [vmem:[%s833_s2] ss:$0 sm:$0xff]  ;;  %v271_v53 = vld [vmem:[#allocation8 + $0x50] sm:$0xff]  ;;  %v273_v56 = vld [vmem:[#allocation8 + $0x60] sm:$0xff] }
  0x55   :  { %493 = vmatprep.mubr.msk.f32.mxu0 %vm689_vm0, %v690_v1  ;;  %528 = vmatpush3.bf16.msra.mxu0 %v527_v36  ;;  %v272_v54 = vld [vmem:[#allocation8 + $0x58] sm:$0xff]  ;;  %v274_v57 = vld [vmem:[#allocation8 + $0x68] sm:$0xff]  ;;  %v275_v59 = vld [vmem:[#allocation8 + $0x70] sm:$0xff] }
  0x56   :  { %510 = vmatpush3.bf16.msra.mxu1 %v509_v17  ;;  %529 = vmatprep.subr.bf16.mxu0 %v688_v0  ;;  %v542_v55 = vpack.c.bf16 %v272_v54, %v271_v53  ;;  %v545_v58 = vpack.c.bf16 %v274_v57, %v273_v56  ;;  %v276_v60 = vld [vmem:[#allocation8 + $0x78] sm:$0xff] }
  0x57   :  { %511 = vmatprep.subr.bf16.mxu1 %v688_v0  ;;  %v548_v61 = vpack.c.bf16 %v276_v60, %v275_v59  ;;  %v374_v62 = vld [vmem:[%s835_s4] ss:$0 sm:$0xff] }
  0x58   :  { %v375_v4 = vld [vmem:[%s837_s6] ss:$0 sm:$0xff] }
  0x59   :  { %531 = vmatpush3.bf16.msra.mxu0 %v530_v38 }
  0x5a   :  { %513 = vmatpush3.bf16.msra.mxu1 %v512_v20  ;;  %532 = vmatprep.subr.bf16.mxu0 %v688_v0 }
  0x5b   :  { %514 = vmatprep.subr.bf16.mxu1 %v688_v0 }
  0x5d   :  { %534 = vmatpush3.bf16.msra.mxu0 %v533_v41 }
  0x5e   :  { %516 = vmatpush3.bf16.msra.mxu1 %v515_v23  ;;  %535 = vmatprep.subr.bf16.mxu0 %v688_v0 }
  0x5f   :  { %517 = vmatprep.subr.bf16.mxu1 %v688_v0 }
  0x61   :  { %537 = vmatpush3.bf16.msra.mxu0 %v536_v44 }
  0x62   :  { %519 = vmatpush3.bf16.msra.mxu1 %v518_v26  ;;  %538 = vmatprep.subr.bf16.mxu0 %v688_v0 }
  0x63   :  { %520 = vmatprep.subr.bf16.mxu1 %v688_v0 }
  0x65   :  { %540 = vmatpush3.bf16.msra.mxu0 %v539_v47 }
  0x66   :  { %522 = vmatpush3.bf16.msra.mxu1 %v521_v29  ;;  %541 = vmatprep.subr.bf16.mxu0 %v688_v0 }
  0x67   :  { %523 = vmatprep.subr.bf16.mxu1 %v688_v0 }
  0x69   :  { %543 = vmatpush3.bf16.msra.mxu0 %v542_v55 }
  0x6a   :  { %525 = vmatpush3.bf16.msra.mxu1 %v524_v32  ;;  %544 = vmatprep.subr.bf16.mxu0 %v688_v0 }
  0x6d   :  { %546 = vmatpush3.bf16.msra.mxu0 %v545_v58 }
  0x6e   :  { %547 = vmatprep.subr.bf16.mxu0 %v688_v0 }
  0x71   :  { %549 = vmatpush3.bf16.msra.mxu0 %v548_v61 }
 0x127   :  { %v162_v49 = vpop.f32.mrb[0].mxu0 }
 0x128   :  { %v163_v50 = vadd.f32 %v372_v48, %v162_v49  ;;  %v425_v51 = vpop.f32.mrb[1].mxu0 }
 0x12a   :  { %560 = vtanh.f32 %v163_v50 }
 0x134   :  { %v561_v52 = vpop.eup %560 }
 0x135   :  { %459 = vmatmul.mubr.f32.vlgmr.msra.gmra.mrb[0].mxu1 %v561_v52 }
 0x208   :  { %v256_v63 = vpop.f32.mrb[0].mxu1 }
 0x209   :  { %v257_v1 = vadd.f32 %v374_v62, %v256_v63  ;;  %v460_v2 = vpop.f32.mrb[1].mxu1 }
 0x20b   :  { %562 = vtanh.f32 %v257_v1 }
 0x215   :  { %v563_v3 = vpop.eup %562 }
 0x216   :  { %494 = vmatmul.mubr.f32.vlgmr.msra.gmra.mrb[2].mxu0 %v563_v3 }
 0x2e9   :  { %v350_v5 = vpop.f32.mrb[2].mxu0 }
 0x2ea   :  { %v351_v6 = vadd.f32 %v375_v4, %v350_v5  ;;  %v495_v0 = vpop.f32.mrb[3].mxu0 }
 0x2ec   :  { %354 = vst [vmem:[#allocation10] sm:$0x3] %v351_v6 }
 0x2ed   :  { %663 = shalt.err (!%p660_p8)
}
 0x2ee   :  { %s664_s9 = scalar_lea.hbm %s838_s7, 32 }
 0x2ef   :  { %p665_p9 = scmp.ne.s32.totalorder %s838_s7, %s664_s9  ;;  %p668_p10 = scmp.lt.u32.totalorder %s664_s9, %s838_s7 }
 0x2f1   :  { %p670_p11 = pnand %p668_p10, %p665_p9 }
 0x2f3   :  { %673 = shalt.err (!%p670_p11)
}
 0x2f4   :  { %364 = dma.vmem_to_hbm [thread:$0]  %s362_s29, 32, %s838_s7, [#allocation4]  }
 0x2f5   :  { %680 = dma.done.wait [#allocation4], 32  }
 0x2f6   :  { %681 = vsyncadd [#allocation4], 4294967264 }
 0x2f7   :  { %368 = vsyncpa [#allocation3], 1 }
 0x2f8   :  { %369 = vsyncpa [#allocation6], 1 }
 0x2f9   :  { %370 = vsyncpa [#allocation9], 1 }
 0x2fa   :  { %371 = vsyncpa [#allocation4], 1 }

</bundles_post_ra>
